<compile_context>
chip_gen: v5e
topology: v5e:2x2
jax: 0.10.0
libtpu: 0.0.40
codegen_flags: <defaults>
</compile_context>

<pallas_src>
import jax
import jax.numpy as jnp
from jax.experimental import pallas as pl
from jax.experimental.pallas import tpu as pltpu


def _round_up(x, m):
    return ((x + m - 1) // m) * m


def _fc_logsoftmax_kernel(x_ref, wd_ref, bd_ref, o_ref):
    """Fused 2-class Linear + LogSoftmax on one batch tile.

    x_ref:  [TB, H]  activation tile (VMEM, input dtype)
    wd_ref: [1, H]   w0 - w1         (VMEM, input dtype)
    bd_ref: [1, 1]   b0 - b1         (SMEM, f32)
    o_ref:  [2, TB]  lane-dense log-probs (VMEM, f32)
    """
    # d = (x @ w0 + b0) - (x @ w1 + b1) = x @ (w0 - w1) + (b0 - b1)
    # Contract over H directly into a lane-dense (1, TB) result; f32 accumulate
    # on the MXU so bf16 activations keep full precision.
    d = jax.lax.dot_general(
        wd_ref[...], x_ref[...],
        dimension_numbers=(((1,), (1,)), ((), ())),
        preferred_element_type=jnp.float32,
    ) + bd_ref[0, 0]                                         # [1, TB] f32

    # Stable softplus(d); softplus(-d) = softplus(d) - d.
    sp = jnp.maximum(d, 0.0) + jnp.log1p(jnp.exp(-jnp.abs(d)))
    o_ref[0:1, :] = (d - sp).astype(o_ref.dtype)             # log p0 = -softplus(-d)
    o_ref[1:2, :] = (-sp).astype(o_ref.dtype)                # log p1 = -softplus(d)


def small_ext_arch_forward(cls_hs, weight, bias, *, max_tile_b=2048,
                           target_tile_bytes=8 << 20):
    """cls_hs: [B, H]; weight: [2, H] (PyTorch nn.Linear layout); bias: [2]."""
    B, H = cls_hs.shape
    C = weight.shape[0]
    assert C == 2, "Small_Ext_Arch has a fixed 2-class head"

    itemsize = jnp.dtype(cls_hs.dtype).itemsize

    # --- batch tile selection -------------------------------------------------
    # Lane-dense output blocks (2, TB) need TB % 128 == 0 unless TB == B.
    if B <= 128:
        TB = B                                     # single tile, full-array block
    else:
        # one x buffer <= target_tile_bytes (re-derived per dtype / hidden size)
        vmem_rows = max(128, ((target_tile_bytes // (H * itemsize)) // 128) * 128)
        # guarantee >= 2 grid steps so both v7x TensorCores get work
        split_rows = _round_up(pl.cdiv(B, 2), 128)
        TB = max(128, min(max_tile_b, vmem_rows, split_rows))
    grid = (pl.cdiv(B, TB),)

    # Raise the scoped-VMEM limit only when the double-buffered stream needs it
    # (v5e default scope is 16 MiB); cap at 32 MiB, safe on all generations.
    dbuf_bytes = 2 * (TB * H * itemsize + C * TB * 4) + 2 * H * itemsize + (1 << 20)
    vmem_limit = (min(_round_up(dbuf_bytes, 1 << 20) + (2 << 20), 32 << 20)
                  if dbuf_bytes > (16 << 20) else None)

    # Fold the 2-class head into a single difference vector (one-time O(H) prep,
    # not per-element pre-scaling).
    w32 = weight.astype(jnp.float32)
    w_diff = (w32[0:1, :] - w32[1:2, :]).astype(cls_hs.dtype)          # [1, H]
    b32 = bias.astype(jnp.float32)
    b_diff = (b32[0] - b32[1]).reshape(1, 1)                           # [1, 1] f32

    cost = pl.CostEstimate(
        flops=2 * B * H + 6 * B,
        transcendentals=2 * B,
        bytes_accessed=B * H * itemsize + H * itemsize + B * C * 4 + 4,
    )

    out_cb = pl.pallas_call(
        _fc_logsoftmax_kernel,
        out_shape=jax.ShapeDtypeStruct((C, B), jnp.float32),   # lane-dense layout
        grid=grid,
        in_specs=[
            pl.BlockSpec((TB, H), lambda i: (i, 0)),                    # x tile
            pl.BlockSpec((1, H), lambda i: (0, 0)),                     # w_diff (resident)
            pl.BlockSpec((1, 1), lambda i: (0, 0),
                         memory_space=pltpu.MemorySpace.SMEM),          # b_diff scalar
        ],
        out_specs=pl.BlockSpec((C, TB), lambda i: (0, i)),
        compiler_params=pltpu.CompilerParams(
            dimension_semantics=("parallel",),
            vmem_limit_bytes=vmem_limit,
        ),
        cost_estimate=cost,
    )(cls_hs, w_diff, b_diff)

    return out_cb.T                                                     # [B, 2]


def reference_forward(cls_hs, weight, bias):
    logits = cls_hs @ weight.T + bias
    return jax.nn.log_softmax(logits, axis=1)


if __name__ == "__main__":
    # Small shapes consistent with the module: batch=8, hidden=32, classes=2
    # (fc1 = nn.Linear(input_size, 2)); cls_hs stands in for the encoder output.
    B, H, C = 8, 32, 2

    key = jax.random.PRNGKey(0)
    k_x, k_w, k_b = jax.random.split(key, 3)
    cls_hs = jax.random.normal(k_x, (B, H), dtype=jnp.float32)
    weight = jax.random.normal(k_w, (C, H), dtype=jnp.float32) * 0.1
    bias = jax.random.normal(k_b, (C,), dtype=jnp.float32) * 0.1

    out = jax.block_until_ready(small_ext_arch_forward(cls_hs, weight, bias))
    ref = reference_forward(cls_hs, weight, bias)
    assert out.shape == (B, C)
    assert jnp.allclose(out, ref, atol=1e-5, rtol=1e-5), "mismatch vs reference (small)"

    # Also exercise the tiled lane-dense path (grid > 1, partial last tile).
    B2, H2 = 384, 256
    k_x2, k_w2, k_b2 = jax.random.split(jax.random.PRNGKey(1), 3)
    cls_hs2 = jax.random.normal(k_x2, (B2, H2), dtype=jnp.float32)
    weight2 = jax.random.normal(k_w2, (C, H2), dtype=jnp.float32) * 0.05
    bias2 = jax.random.normal(k_b2, (C,), dtype=jnp.float32) * 0.05
    out2 = jax.block_until_ready(small_ext_arch_forward(cls_hs2, weight2, bias2))
    ref2 = reference_forward(cls_hs2, weight2, bias2)
    assert out2.shape == (B2, C)
    assert jnp.allclose(out2, ref2, atol=1e-4, rtol=1e-4), "mismatch vs reference (tiled)"

    print("KERNEL_OK")
</pallas_src>

<mosaic_0001>
module attributes {stable_mosaic.version = 11 : i64} {
  func.func @_fc_logsoftmax_kernel(%arg0: i32, %arg1: memref<8x32xf32, #tpu.memory_space<vmem>>, %arg2: memref<1x32xf32, #tpu.memory_space<vmem>>, %arg3: memref<1x1xf32, #tpu.memory_space<smem>>, %arg4: memref<2x8xf32, #tpu.memory_space<vmem>>) attributes {dimension_semantics = [#tpu.dimension_semantics<parallel>], iteration_bounds = array<i64: 1>, scalar_prefetch = 0 : i64, scratch_operands = 0 : i64, tpu.core_type = #tpu.core_type<tc>, window_params = [{transform_indices = @transform_0, window_bounds = array<i64: 8, 32>}, {pipeline_mode = #tpu.pipeline_mode<synchronous>, transform_indices = @transform_1, window_bounds = array<i64: 1, 32>}, {transform_indices = @transform_2, window_bounds = array<i64: 1, 1>}, {transform_indices = @transform_3, window_bounds = array<i64: 2, 8>}]} {
    %c0 = arith.constant 0 : index
    %c0_0 = arith.constant 0 : index
    %0 = vector.load %arg2[%c0, %c0_0] : memref<1x32xf32, #tpu.memory_space<vmem>>, vector<1x32xf32>
    %c0_1 = arith.constant 0 : index
    %c0_2 = arith.constant 0 : index
    %1 = vector.load %arg1[%c0_1, %c0_2] : memref<8x32xf32, #tpu.memory_space<vmem>>, vector<8x32xf32>
    %cst = arith.constant dense<0.000000e+00> : vector<1x8xf32>
    %2 = tpu.matmul %0, %1, %cst {dimension_numbers = #tpu.dot_dimension_numbers<[1], [1], [0], [0], [0, 0, 1, 0], [], []>} : vector<1x32xf32>, vector<8x32xf32>, vector<1x8xf32> -> vector<1x8xf32>
    %c0_3 = arith.constant 0 : index
    %c0_4 = arith.constant 0 : index
    %3 = memref.load %arg3[%c0_3, %c0_4] : memref<1x1xf32, #tpu.memory_space<smem>>
    %4 = vector.broadcast %3 : f32 to vector<1x8xf32>
    %5 = arith.addf %2, %4 : vector<1x8xf32>
    %cst_5 = arith.constant 0.000000e+00 : f32
    %6 = vector.broadcast %cst_5 : f32 to vector<1x8xf32>
    %7 = arith.maximumf %5, %6 : vector<1x8xf32>
    %8 = math.absf %5 : vector<1x8xf32>
    %cst_6 = arith.constant 0.000000e+00 : f32
    %9 = vector.broadcast %cst_6 : f32 to vector<1x8xf32>
    %10 = arith.subf %9, %8 : vector<1x8xf32>
    %11 = math.exp %10 : vector<1x8xf32>
    %12 = math.log1p %11 : vector<1x8xf32>
    %13 = arith.addf %7, %12 : vector<1x8xf32>
    %14 = arith.subf %5, %13 : vector<1x8xf32>
    %c0_7 = arith.constant 0 : index
    %c0_8 = arith.constant 0 : index
    %15 = vector.load %arg4[%c0_7, %c0_8] : memref<2x8xf32, #tpu.memory_space<vmem>>, vector<1x8xf32>
    tpu.vector_store %arg4[%c0_7, %c0_8], %14 {strides = array<i32>} : memref<2x8xf32, #tpu.memory_space<vmem>>, vector<1x8xf32>,
    %cst_9 = arith.constant 0.000000e+00 : f32
    %16 = vector.broadcast %cst_9 : f32 to vector<1x8xf32>
    %17 = arith.subf %16, %13 : vector<1x8xf32>
    %c1 = arith.constant 1 : index
    %c0_10 = arith.constant 0 : index
    %18 = vector.load %arg4[%c1, %c0_10] : memref<2x8xf32, #tpu.memory_space<vmem>>, vector<1x8xf32>
    tpu.vector_store %arg4[%c1, %c0_10], %17 {strides = array<i32>} : memref<2x8xf32, #tpu.memory_space<vmem>>, vector<1x8xf32>,
    return
  }
  func.func @transform_0(%arg0: i32) -> (i32, i32) {
    %c0_i32 = arith.constant 0 : i32
    %c0_i32_0 = arith.constant 0 : i32
    return %arg0, %c0_i32 : i32, i32
  }
  func.func @transform_1(%arg0: i32) -> (i32, i32) {
    %c0_i32 = arith.constant 0 : i32
    %c0_i32_0 = arith.constant 0 : i32
    %c0_i32_1 = arith.constant 0 : i32
    return %c0_i32, %c0_i32_0 : i32, i32
  }
  func.func @transform_2(%arg0: i32) -> (i32, i32) {
    %c0_i32 = arith.constant 0 : i32
    %c0_i32_0 = arith.constant 0 : i32
    %c0_i32_1 = arith.constant 0 : i32
    return %c0_i32, %c0_i32_0 : i32, i32
  }
  func.func @transform_3(%arg0: i32) -> (i32, i32) {
    %c0_i32 = arith.constant 0 : i32
    %c0_i32_0 = arith.constant 0 : i32
    return %c0_i32, %arg0 : i32, i32
  }
}

</mosaic_0001>

<bundles_post_ra>
// kernel: tpu_custom_call.1
= control target key start
LH: loop header
LB: loop body
LE: loop exit
PB: predicated region body
PF: predicated region fallthrough
CT: control target
= control target key end

     0   :  { %9 = vsyncpa [#allocation4], 0  ;;  %s192_s0 = inlined_call_operand.hbm [shape: f32[8,32], index: 0, kind: input, shape index: {}]   ;;  %s193_s1 = inlined_call_operand.vmem [shape: f32[1,32], index: 1, kind: input, shape index: {}]   ;;  %s194_s2 = inlined_call_operand.<no memory space> [shape: f32[1,1], index: 2, kind: input, shape index: {}]   ;;  %s195_s3 = inlined_call_operand.hbm [shape: f32[2,8], index: 3, kind: output, shape index: {}]  }
   0x1   :  { %10 = vsyncpa [#allocation5], 0  ;;  %s16_s14 = sshll.u32 %s192_s0, 4  ;;  %s158_s15 = smov [#allocation3]   ;;  %s17_s14 = int_to_ptr.hbm [resolvable:$true] %s16_s14 }
   0x2   :  { %s18_s16 = sshll.u32 %s158_s15, 4  ;;  %s19_s16 = int_to_ptr.vmem [resolvable:$true] %s18_s16 }
   0x3   :  { %21 = dma.hbm_to_vmem [thread:$0]  %s17_s14, 128, %s19_s16, [#allocation4]  }
   0x4   :  { %154 = dma.done.wait [#allocation4], 128  }
   0x5   :  { %155 = vsyncadd [#allocation4], 4294967168  ;;  %vm34_vm0 = vcmask 261120   ;;  %v31_v0 = vld [vmem:[#allocation3] sm:$0xff]  ;;  %v33_v2 = vstv %s194_s2  ;;  %s159_s0 = smov [#allocation6]   ;;  %s88_s22 = sshll.u32 %s195_s3, 4  ;;  %s89_s22 = int_to_ptr.hbm [resolvable:$true] %s88_s22 }
   0x6   :  { %98 = vmatpush.xpose.msk.msra.mxu0 %vm34_vm0, %v31_v0  ;;  %v30_v1 = vld [vmem:[%s193_s1] sm:$0x1]  ;;  %s86_s1 = sshll.u32 %s159_s0, 4  ;;  %vm77_vm2 = vcmask 57344   ;;  %s87_s1 = int_to_ptr.vmem [resolvable:$true] %s86_s1 }
   0x9   :  { %99 = vmatmul.msk.f32.vlgmr.msra.gmra.mxu0 %vm34_vm0, %v30_v1 }
  0x86   :  { %v58_v3 = vpop.f32.mrf.mxu0 }
  0x87   :  { %v59_v4 = vadd.f32 %v58_v3, %v33_v2 }
  0x89   :  { %v62_v5 = vand.u32 2147483647, %v59_v4  ;;  %v61_v16 = vmax.f32 %v59_v4, 0.0 }
  0x8b   :  { %v63_v6 = vsub.f32 0.0, %v62_v5 }
  0x8d   :  { %v64_v7 = vmul.f32 1.442695, %v63_v6 }
  0x8f   :  { %102 = vpow2.f32 %v64_v7 }
  0x95   :  { %v103_v8 = vpop.eup %102 }
  0x96   :  { %v66_v9 = vadd.f32 1.0, %v103_v8  ;;  %v69_v10 = vmul.f32 -0.5, %v103_v8  ;;  %v72_v12 = vand.u32 2147483647, %v103_v8 }
  0x98   :  { %104 = vlog2.f32 %v66_v9  ;;  %v70_v11 = vadd.f32 1.0, %v69_v10  ;;  %vm73_vm1 = vcmp.lt.f32.partialorder %v72_v12, 0.0004427343 }
  0x9a   :  { %v71_v15 = vmul.f32 %v103_v8, %v70_v11 }
  0x9e   :  { %v105_v13 = vpop.eup %104 }
  0x9f   :  { %v68_v14 = vmul.f32 0.6931472, %v105_v13 }
  0xa1   :  { %v74_v17 = vsel %vm73_vm1, %v71_v15, %v68_v14 }
  0xa2   :  { %v75_v18 = vadd.f32 %v74_v17, %v61_v16 }
  0xa4   :  { %v76_v19 = vsub.f32 %v59_v4, %v75_v18  ;;  %v79_v20 = vsub.f32 0.0, %v75_v18 }
  0xa6   :  { %78 = vst.msk [vmem:[#allocation6] sm:$0x1] %vm77_vm2, %v76_v19 }
  0xa7   :  { %80 = vst.msk [vmem:[#allocation6 + $0x1] sm:$0x1] %vm77_vm2, %v79_v20 }
  0xa8   :  { %91 = dma.vmem_to_hbm [thread:$0]  %s87_s1, 32, %s89_s22, [#allocation5]  }
  0xa9   :  { %156 = dma.done.wait [#allocation5], 32  }
  0xaa   :  { %157 = vsyncadd [#allocation5], 4294967264 }
  0xab   :  { %96 = vsyncpa [#allocation4], 1 }
  0xac   :  { %97 = vsyncpa [#allocation5], 1 }

</bundles_post_ra>
